<compile_context>
chip_gen: v5e
topology: v5e:2x2
jax: 0.10.0
libtpu: 0.0.40
codegen_flags: <defaults>
</compile_context>

<pallas_src>
import math

import jax
import jax.numpy as jnp
from jax.experimental import pallas as pl
from jax.experimental.pallas import tpu as pltpu


_TARGET_BLOCK_BYTES = 2 * 1024 * 1024  # per-buffer block size (v7x-safe)


def make_flip_restrict_param(n, dtype=jnp.float32):
    """Deterministic parameter from FlipRestrict.__init__ (reference check only):
    top-left n x n identity; row n+i has a 1.0 at column 2n-i-1."""
    a = jnp.zeros((2 * n, 2 * n), dtype=dtype)
    a = a.at[:n, :n].set(jnp.eye(n, dtype=dtype))
    rows = n + jnp.arange(n)
    cols = 2 * n - 1 - jnp.arange(n)
    a = a.at[rows, cols].set(1.0)
    return a


def _make_kernel(n, pack):
    """Pure copy + within-group channel permutation. No MXU, no casts."""
    d = 2 * n

    def kernel(x_ref, o_ref):
        # x_ref / o_ref: (Gt, pack * d, HWt); all indices below are static.
        for p in range(pack):
            base = p * d
            # First n channels of the group: identity (one contiguous copy).
            o_ref[:, base:base + n, :] = x_ref[:, base:base + n, :]
            # Last n channels: reversed order.
            for i in range(n):
                src = base + 2 * n - 1 - i
                dst = base + n + i
                o_ref[:, dst:dst + 1, :] = x_ref[:, src:src + 1, :]

    return kernel


def _choose_tiles(num_sgroups, sublanes, hw, itemsize):
    """Pick (super-groups-per-block, lanes-per-block) targeting ~2 MiB blocks."""
    row_bytes = sublanes * itemsize
    if hw * row_bytes <= _TARGET_BLOCK_BYTES:
        hwt = hw                                   # full lane extent (legal)
    else:
        hwt = max(128, min(hw, (_TARGET_BLOCK_BYTES // row_bytes) // 128 * 128))
    gt = max(1, min(num_sgroups, _TARGET_BLOCK_BYTES // (sublanes * hwt * itemsize)))
    return int(gt), int(hwt)


def flip_restrict(x, n, num_in_rep):
    """Forward pass of FlipRestrict (param is fixed, so it is folded into the
    kernel as a static channel permutation)."""
    B, C, H, W = x.shape
    d = 2 * n
    assert C == num_in_rep * d, "channel dim must equal num_in_rep * 2n"
    G = B * num_in_rep
    HW = H * W
    itemsize = jnp.dtype(x.dtype).itemsize

    # Pack groups so the sublane extent (pack*d) is a multiple of the sublane
    # tile for this dtype (8 for f32); fall back to pack=1 (full-extent dim,
    # still legal, just sublane-padded) if G is not divisible.
    sub_mult = {4: 8, 2: 16, 1: 32}.get(itemsize, 8)
    pack = sub_mult // math.gcd(d, sub_mult)
    if G % pack != 0:
        pack = 1
    GP = G // pack
    SD = pack * d

    gt, hwt = _choose_tiles(GP, SD, HW, itemsize)
    grid = (pl.cdiv(GP, gt), pl.cdiv(HW, hwt))

    xp = x.reshape(GP, SD, HW)

    out = pl.pallas_call(
        _make_kernel(n, pack),
        out_shape=jax.ShapeDtypeStruct((GP, SD, HW), x.dtype),
        grid=grid,
        in_specs=[pl.BlockSpec((gt, SD, hwt), lambda i, j: (i, 0, j))],
        out_specs=pl.BlockSpec((gt, SD, hwt), lambda i, j: (i, 0, j)),
        compiler_params=pltpu.CompilerParams(
            dimension_semantics=("parallel", "parallel")),
        cost_estimate=pl.CostEstimate(
            flops=0, transcendentals=0, bytes_accessed=2 * x.size * itemsize),
    )(xp)

    return out.reshape(B, C, H, W)


if __name__ == "__main__":
    # Small shapes consistent with the module: n=2 -> dim=4, num_in_rep=2
    # -> channels = 2 * 4 = 8; batch=2, spatial=16x16.
    n = 2
    num_in_rep = 2
    B, H, W = 2, 16, 16
    C = num_in_rep * 2 * n

    key = jax.random.PRNGKey(0)
    x = jax.random.normal(key, (B, C, H, W), dtype=jnp.float32)

    y = flip_restrict(x, n, num_in_rep)
    y = jax.block_until_ready(y)

    # Pure-JAX reference of the PyTorch forward (einsum with the fixed param).
    param = make_flip_restrict_param(n, dtype=jnp.float32)
    x5 = x.reshape(B, num_in_rep, 2 * n, H, W)
    y_ref = jnp.einsum("ij,bkjmn->bkimn", param, x5).reshape(x.shape)
    assert y.shape == x.shape and y.dtype == x.dtype
    assert jnp.allclose(y, y_ref, atol=1e-6, rtol=1e-6)

    print("KERNEL_OK")
</pallas_src>

<mosaic_0001>
module attributes {stable_mosaic.version = 11 : i64} {
  func.func @kernel(%arg0: i32, %arg1: i32, %arg2: memref<2x8x256xf32, #tpu.memory_space<vmem>>, %arg3: memref<2x8x256xf32, #tpu.memory_space<vmem>>) attributes {dimension_semantics = [#tpu.dimension_semantics<parallel>, #tpu.dimension_semantics<parallel>], iteration_bounds = array<i64: 1, 1>, scalar_prefetch = 0 : i64, scratch_operands = 0 : i64, tpu.core_type = #tpu.core_type<tc>, window_params = [{transform_indices = @transform_0, window_bounds = array<i64: 2, 8, 256>}, {transform_indices = @transform_1, window_bounds = array<i64: 2, 8, 256>}]} {
    %c0 = arith.constant 0 : index
    %c0_0 = arith.constant 0 : index
    %c0_1 = arith.constant 0 : index
    %0 = vector.load %arg2[%c0, %c0_0, %c0_1] : memref<2x8x256xf32, #tpu.memory_space<vmem>>, vector<2x2x256xf32>
    %c0_2 = arith.constant 0 : index
    %c0_3 = arith.constant 0 : index
    %c0_4 = arith.constant 0 : index
    %1 = vector.load %arg3[%c0_2, %c0_3, %c0_4] : memref<2x8x256xf32, #tpu.memory_space<vmem>>, vector<2x2x256xf32>
    tpu.vector_store %arg3[%c0_2, %c0_3, %c0_4], %0 {strides = array<i32>} : memref<2x8x256xf32, #tpu.memory_space<vmem>>, vector<2x2x256xf32>,
    %c0_5 = arith.constant 0 : index
    %c3 = arith.constant 3 : index
    %c0_6 = arith.constant 0 : index
    %2 = vector.load %arg2[%c0_5, %c3, %c0_6] : memref<2x8x256xf32, #tpu.memory_space<vmem>>, vector<2x1x256xf32>
    %c0_7 = arith.constant 0 : index
    %c2 = arith.constant 2 : index
    %c0_8 = arith.constant 0 : index
    %3 = vector.load %arg3[%c0_7, %c2, %c0_8] : memref<2x8x256xf32, #tpu.memory_space<vmem>>, vector<2x1x256xf32>
    tpu.vector_store %arg3[%c0_7, %c2, %c0_8], %2 {strides = array<i32>} : memref<2x8x256xf32, #tpu.memory_space<vmem>>, vector<2x1x256xf32>,
    %c0_9 = arith.constant 0 : index
    %c2_10 = arith.constant 2 : index
    %c0_11 = arith.constant 0 : index
    %4 = vector.load %arg2[%c0_9, %c2_10, %c0_11] : memref<2x8x256xf32, #tpu.memory_space<vmem>>, vector<2x1x256xf32>
    %c0_12 = arith.constant 0 : index
    %c3_13 = arith.constant 3 : index
    %c0_14 = arith.constant 0 : index
    %5 = vector.load %arg3[%c0_12, %c3_13, %c0_14] : memref<2x8x256xf32, #tpu.memory_space<vmem>>, vector<2x1x256xf32>
    tpu.vector_store %arg3[%c0_12, %c3_13, %c0_14], %4 {strides = array<i32>} : memref<2x8x256xf32, #tpu.memory_space<vmem>>, vector<2x1x256xf32>,
    %c0_15 = arith.constant 0 : index
    %c4 = arith.constant 4 : index
    %c0_16 = arith.constant 0 : index
    %6 = vector.load %arg2[%c0_15, %c4, %c0_16] : memref<2x8x256xf32, #tpu.memory_space<vmem>>, vector<2x2x256xf32>
    %c0_17 = arith.constant 0 : index
    %c4_18 = arith.constant 4 : index
    %c0_19 = arith.constant 0 : index
    %7 = vector.load %arg3[%c0_17, %c4_18, %c0_19] : memref<2x8x256xf32, #tpu.memory_space<vmem>>, vector<2x2x256xf32>
    tpu.vector_store %arg3[%c0_17, %c4_18, %c0_19], %6 {strides = array<i32>} : memref<2x8x256xf32, #tpu.memory_space<vmem>>, vector<2x2x256xf32>,
    %c0_20 = arith.constant 0 : index
    %c7 = arith.constant 7 : index
    %c0_21 = arith.constant 0 : index
    %8 = vector.load %arg2[%c0_20, %c7, %c0_21] : memref<2x8x256xf32, #tpu.memory_space<vmem>>, vector<2x1x256xf32>
    %c0_22 = arith.constant 0 : index
    %c6 = arith.constant 6 : index
    %c0_23 = arith.constant 0 : index
    %9 = vector.load %arg3[%c0_22, %c6, %c0_23] : memref<2x8x256xf32, #tpu.memory_space<vmem>>, vector<2x1x256xf32>
    tpu.vector_store %arg3[%c0_22, %c6, %c0_23], %8 {strides = array<i32>} : memref<2x8x256xf32, #tpu.memory_space<vmem>>, vector<2x1x256xf32>,
    %c0_24 = arith.constant 0 : index
    %c6_25 = arith.constant 6 : index
    %c0_26 = arith.constant 0 : index
    %10 = vector.load %arg2[%c0_24, %c6_25, %c0_26] : memref<2x8x256xf32, #tpu.memory_space<vmem>>, vector<2x1x256xf32>
    %c0_27 = arith.constant 0 : index
    %c7_28 = arith.constant 7 : index
    %c0_29 = arith.constant 0 : index
    %11 = vector.load %arg3[%c0_27, %c7_28, %c0_29] : memref<2x8x256xf32, #tpu.memory_space<vmem>>, vector<2x1x256xf32>
    tpu.vector_store %arg3[%c0_27, %c7_28, %c0_29], %10 {strides = array<i32>} : memref<2x8x256xf32, #tpu.memory_space<vmem>>, vector<2x1x256xf32>,
    return
  }
  func.func @transform_0(%arg0: i32, %arg1: i32) -> (i32, i32, i32) {
    %c0_i32 = arith.constant 0 : i32
    %c0_i32_0 = arith.constant 0 : i32
    return %arg0, %c0_i32, %arg1 : i32, i32, i32
  }
  func.func @transform_1(%arg0: i32, %arg1: i32) -> (i32, i32, i32) {
    %c0_i32 = arith.constant 0 : i32
    %c0_i32_0 = arith.constant 0 : i32
    return %arg0, %c0_i32, %arg1 : i32, i32, i32
  }
}

</mosaic_0001>

<bundles_post_ra>
// kernel: tpu_custom_call.1
= control target key start
LH: loop header
LB: loop body
LE: loop exit
PB: predicated region body
PF: predicated region fallthrough
CT: control target
= control target key end

     0   :  { %6 = vsyncpa [#allocation3], 0  ;;  %s206_s0 = inlined_call_operand.hbm [shape: f32[2,8,256], index: 0, kind: input, shape index: {}]   ;;  %s207_s1 = inlined_call_operand.hbm [shape: f32[2,8,256], index: 1, kind: output, shape index: {}]  }
   0x1   :  { %7 = vsyncpa [#allocation4], 0  ;;  %s12_s8 = sshll.u32 %s206_s0, 4  ;;  %s160_s9 = smov [#allocation2]   ;;  %s13_s8 = int_to_ptr.hbm [resolvable:$true] %s12_s8 }
   0x2   :  { %s14_s10 = sshll.u32 %s160_s9, 4  ;;  %s161_s11 = smov 256   ;;  %s15_s10 = int_to_ptr.vmem [resolvable:$true] %s14_s10 }
   0x3   :  { %s162_s12 = smov 16  }
   0x4   :  { %20 = dma.hbm_to_vmem [thread:$0]  %s13_s8, 512, %s15_s10, [#allocation3], %s161_s11, %s161_s11, %s162_s12  }
   0x5   :  { %156 = dma.done.wait [#allocation3], 512  }
   0x6   :  { %157 = vsyncadd [#allocation3], 4294966784  ;;  %v37_v0 = vlaneseq  ;;  %v25_v1 = vld [vmem:[#allocation2] sm:$0x3]  ;;  %v26_v2 = vld [vmem:[#allocation2 + $0x8] sm:$0x3] }
   0x7   :  { %v27_v3 = vld [vmem:[#allocation2 + $0x10] sm:$0x3]  ;;  %29 = vst [vmem:[#allocation5] sm:$0x3] %v25_v1  ;;  %v28_v4 = vld [vmem:[#allocation2 + $0x18] sm:$0x3] }
   0x8   :  { %30 = vst [vmem:[#allocation5 + $0x8] sm:$0x3] %v26_v2  ;;  %v34_v5 = vld [vmem:[#allocation2 + $0x3] ss:$8 sm:$0x3]  ;;  %vm180_vm0 = vcmp.lt.s32.totalorder %v37_v0, 256 }
   0x9   :  { %31 = vst [vmem:[#allocation5 + $0x10] sm:$0x3] %v27_v3  ;;  %v36_v7 = vld [vmem:[#allocation2 + $0x13] ss:$8 sm:$0x3]  ;;  %s91_s14 = sshll.u32 %s207_s1, 4  ;;  %s92_s14 = int_to_ptr.hbm [resolvable:$true] %s91_s14 }
   0xa   :  { %32 = vst [vmem:[#allocation5 + $0x18] sm:$0x3] %v28_v4  ;;  %v48_v8 = vld [vmem:[#allocation2 + $0x2] ss:$8 sm:$0x3]  ;;  %s163_s15 = smov [#allocation5]  }
   0xb   :  { %42 = vst.msk [vmem:[#allocation5 + $0x2] ss:$8 sm:$0x3] %vm180_vm0, %v34_v5  ;;  %v50_v9 = vld [vmem:[#allocation2 + $0x12] ss:$8 sm:$0x3] }
   0xc   :  { %45 = vst.msk [vmem:[#allocation5 + $0x12] ss:$8 sm:$0x3] %vm180_vm0, %v36_v7  ;;  %v57_v10 = vld [vmem:[#allocation2] sm:$0x30]  ;;  %s89_s16 = sshll.u32 %s163_s15, 4  ;;  %s90_s16 = int_to_ptr.vmem [resolvable:$true] %s89_s16 }
   0xd   :  { %52 = vst.msk [vmem:[#allocation5 + $0x3] ss:$8 sm:$0x3] %vm180_vm0, %v48_v8  ;;  %v58_v11 = vld [vmem:[#allocation2 + $0x8] sm:$0x30] }
   0xe   :  { %55 = vst.msk [vmem:[#allocation5 + $0x13] ss:$8 sm:$0x3] %vm180_vm0, %v50_v9  ;;  %v59_v12 = vld [vmem:[#allocation2 + $0x10] sm:$0x30] }
   0xf   :  { %61 = vst [vmem:[#allocation5] sm:$0x30] %v57_v10  ;;  %v60_v13 = vld [vmem:[#allocation2 + $0x18] sm:$0x30] }
  0x10   :  { %62 = vst [vmem:[#allocation5 + $0x8] sm:$0x30] %v58_v11  ;;  %v66_v14 = vld [vmem:[#allocation2 + $0x7] ss:$8 sm:$0x3] }
  0x11   :  { %63 = vst [vmem:[#allocation5 + $0x10] sm:$0x30] %v59_v12  ;;  %v68_v15 = vld [vmem:[#allocation2 + $0x17] ss:$8 sm:$0x3] }
  0x12   :  { %64 = vst [vmem:[#allocation5 + $0x18] sm:$0x30] %v60_v13  ;;  %v76_v16 = vld [vmem:[#allocation2 + $0x6] ss:$8 sm:$0x3] }
  0x13   :  { %70 = vst.msk [vmem:[#allocation5 + $0x6] ss:$8 sm:$0x3] %vm180_vm0, %v66_v14  ;;  %v78_v17 = vld [vmem:[#allocation2 + $0x16] ss:$8 sm:$0x3] }
  0x14   :  { %73 = vst.msk [vmem:[#allocation5 + $0x16] ss:$8 sm:$0x3] %vm180_vm0, %v68_v15 }
  0x15   :  { %80 = vst.msk [vmem:[#allocation5 + $0x7] ss:$8 sm:$0x3] %vm180_vm0, %v76_v16 }
  0x16   :  { %83 = vst.msk [vmem:[#allocation5 + $0x17] ss:$8 sm:$0x3] %vm180_vm0, %v78_v17 }
  0x17   :  { %97 = dma.vmem_to_hbm [thread:$0]  %s90_s16, 512, %s92_s14, [#allocation4], %s161_s11, %s161_s11, %s162_s12  }
  0x18   :  { %158 = dma.done.wait [#allocation4], 512  }
  0x19   :  { %159 = vsyncadd [#allocation4], 4294966784 }
  0x1a   :  { %102 = vsyncpa [#allocation3], 1 }
  0x1b   :  { %103 = vsyncpa [#allocation4], 1 }

</bundles_post_ra>
